<compile_context>
chip_gen: v7x
topology: tpu7x:2x2x1
jax: 0.10.0
libtpu: 0.0.40
codegen_flags: <defaults>
</compile_context>

<pallas_src>
import functools

import jax
import jax.numpy as jnp
from jax import lax
from jax.experimental import pallas as pl
from jax.experimental.pallas import tpu as pltpu


def _round_up(x, m):
    return ((x + m - 1) // m) * m


def _default_pack():
    """Generation-aware lane-packing factor (see header comment)."""
    try:
        kind = jax.devices()[0].device_kind.lower()
    except Exception:
        return 8
    if "v5 lite" in kind or "v5lite" in kind or "v5e" in kind:
        return 4          # keep below v5e's ~240 flop/B HBM/MXU ridge
    if "v6" in kind:
        return 16         # 128-lane output slab; AI stays below v6e ridge
    if "7" in kind:
        return 8          # v7x: highest HBM BW, don't flip compute-bound
    return 8


def expand_decoder_params(params, *, pack, compute_dtype=jnp.bfloat16):
    """One-time block-diagonal weight / tiled-bias expansion for lane packing.

    Call this ONCE (outside the per-step forward); the result is a function of
    static parameters only.
    """
    w1, b1, w2, b2 = params
    cdt = compute_dtype
    eye = jnp.eye(pack, dtype=cdt)
    w1e = jnp.kron(eye, w1.astype(cdt))                   # (P*d_in,  P*hidden)
    w2e = jnp.kron(eye, w2.astype(cdt))                   # (P*hidden, P*d_out)
    b1e = jnp.tile(b1.astype(jnp.float32).reshape(1, -1), (1, pack))
    b2e = jnp.tile(b2.astype(jnp.float32).reshape(1, -1), (1, pack))
    return (w1e, b1e, w2e, b2e)


def _decoder_mlp_kernel(x_ref, w1_ref, b1_ref, w2_ref, b2_ref, o_ref, *,
                        compute_dtype, sub_rows, unroll):
    """One grid step: packed (tile_p, P*d_in) -> (tile_p, P*d_out) MLP."""
    w1 = w1_ref[...]          # (P*d_in,  P*hidden), compute_dtype, block-diag
    w2 = w2_ref[...]          # (P*hidden, P*d_out), compute_dtype, block-diag
    cols_h = w1.shape[1]
    cols_o = w2.shape[1]

    # Hoist the bias broadcasts out of the chunk loop: JAX does not CSE
    # broadcast_in_dim, so doing this per chunk re-emits a sublane broadcast.
    b1_full = jnp.broadcast_to(b1_ref[...], (sub_rows, cols_h))
    b2_full = jnp.broadcast_to(b2_ref[...], (sub_rows, cols_o))

    def chunk(row0, rows, b1b, b2b):
        x = x_ref[pl.ds(row0, rows), :].astype(compute_dtype)
        h = jnp.dot(x, w1, preferred_element_type=jnp.float32)
        h = jnp.maximum(h + b1b, 0.0)                     # f32 bias + ReLU (VPU)
        y = jnp.dot(h.astype(compute_dtype), w2,
                    preferred_element_type=jnp.float32)
        o_ref[pl.ds(row0, rows), :] = (y + b2b).astype(o_ref.dtype)

    tile_rows = x_ref.shape[0]
    n_full = tile_rows // sub_rows
    rem = tile_rows % sub_rows

    if n_full > 0:
        u = max(1, min(unroll, n_full))                   # capped unroll

        def body(c, carry):
            chunk(pl.multiple_of(c * sub_rows, sub_rows), sub_rows,
                  b1_full, b2_full)
            return carry

        lax.fori_loop(0, n_full, body, 0, unroll=u)
    if rem:                                               # static tail chunk
        chunk(n_full * sub_rows, rem,
              jnp.broadcast_to(b1_ref[...], (rem, cols_h)),
              jnp.broadcast_to(b2_ref[...], (rem, cols_o)))


def decoder_forward(node_features, expanded_params, *, pack, tile_n=32768,
                    compute_dtype=jnp.bfloat16, out_dtype=jnp.float32,
                    min_grid_steps=4, unroll=4):
    """Applies the decoder MLP row-wise to node_features with a Pallas kernel.

    `expanded_params` must come from expand_decoder_params(params, pack=pack).
    `tile_n` is the (approximate) number of ORIGINAL node rows per grid step.
    """
    w1e, b1e, w2e, b2e = expanded_params
    n, d_in = node_features.shape
    assert w1e.shape[0] == pack * d_in, (w1e.shape, pack, d_in)
    hidden = w1e.shape[1] // pack
    d_out = w2e.shape[1] // pack
    assert w2e.shape[0] == pack * hidden

    # Lane packing is a bit-exact view; it only needs the node count to be a
    # multiple of `pack` (real callers should pre-pad node arrays to avoid
    # this copy entirely).
    n_pad = _round_up(n, pack)
    if n_pad != n:
        node_features = jnp.pad(node_features, ((0, n_pad - n), (0, 0)))

    # Free, bit-exact lane packing: [n, d] row-major == [n/pack, pack*d].
    packed_rows = n_pad // pack
    x_packed = node_features.reshape(packed_rows, pack * d_in)

    x_itemsize = x_packed.dtype.itemsize
    out_itemsize = jnp.dtype(out_dtype).itemsize

    # ---- Tile selection (multiples of 16: bf16 sublane packing). ----
    tile_p = _round_up(max(tile_n // pack, 16), 16)
    # Rows whose x-tile is ~1 MiB: only shrink tiles for grid-step count if
    # each step still moves at least this much.
    one_mb_rows = _round_up(
        max(16, (1 << 20) // max(1, pack * d_in * x_itemsize)), 16)
    cap = _round_up(pl.cdiv(packed_rows, min_grid_steps), 16)
    if cap >= one_mb_rows:
        tile_p = min(tile_p, cap)       # >= min_grid_steps steps (>=2/core v7x)
    if tile_p >= packed_rows:
        tile_p = packed_rows            # single full-extent block: always legal
    grid = (pl.cdiv(packed_rows, tile_p),)   # ragged last block is masked

    # ---- In-kernel sub-chunk size: keep f32 hidden activations ~16 vregs
    # (64 KiB) regardless of the DMA tile size; multiple of 16. ----
    sub_rows = max(16, ((16 * 1024) // max(1, pack * hidden)) // 16 * 16)
    sub_rows = min(sub_rows, 256)
    sub_rows = max(1, min(sub_rows, tile_p))

    kernel = functools.partial(_decoder_mlp_kernel,
                               compute_dtype=compute_dtype,
                               sub_rows=sub_rows, unroll=unroll)

    # ---- Advisory cost + explicit VMEM budget (v5e default is only 16 MiB).
    x_tile_bytes = tile_p * pack * d_in * x_itemsize
    out_tile_bytes = tile_p * pack * d_out * out_itemsize
    w_bytes = (w1e.size * w1e.dtype.itemsize + w2e.size * w2e.dtype.itemsize
               + b1e.size * b1e.dtype.itemsize + b2e.size * b2e.dtype.itemsize)
    vmem_est = 3 * (x_tile_bytes + out_tile_bytes) + 3 * w_bytes + (8 << 20)
    vmem_limit = int(min(48 << 20, max(24 << 20, vmem_est)))

    in_bytes = n_pad * d_in * x_itemsize
    out_bytes = n_pad * d_out * out_itemsize
    cost = pl.CostEstimate(
        flops=2 * n_pad * pack * (d_in * hidden + hidden * d_out),
        transcendentals=0,
        bytes_accessed=in_bytes + out_bytes + w_bytes)

    y_packed = pl.pallas_call(
        kernel,
        out_shape=jax.ShapeDtypeStruct((packed_rows, pack * d_out), out_dtype),
        grid_spec=pltpu.PrefetchScalarGridSpec(
            num_scalar_prefetch=0,
            grid=grid,
            in_specs=[
                pl.BlockSpec((tile_p, pack * d_in), lambda i: (i, 0)),   # x tile
                pl.BlockSpec((pack * d_in, pack * hidden), lambda i: (0, 0)),
                pl.BlockSpec((1, pack * hidden), lambda i: (0, 0)),
                pl.BlockSpec((pack * hidden, pack * d_out), lambda i: (0, 0)),
                pl.BlockSpec((1, pack * d_out), lambda i: (0, 0)),
            ],
            out_specs=pl.BlockSpec((tile_p, pack * d_out), lambda i: (i, 0)),
        ),
        compiler_params=pltpu.CompilerParams(
            dimension_semantics=("parallel",),
            vmem_limit_bytes=vmem_limit),
        cost_estimate=cost,
    )(x_packed, w1e, b1e, w2e, b2e)

    # Undo the lane packing (bit-exact reshape) and drop padded rows.
    return y_packed.reshape(n_pad, d_out)[:n]


def init_decoder_params(key, d_in, hidden, d_out, dtype=jnp.float32):
    """Deterministic init mimicking PyTorch nn.Linear default
    (uniform(-1/sqrt(fan_in), 1/sqrt(fan_in)))."""
    k1, k2, k3, k4 = jax.random.split(key, 4)
    bound1 = 1.0 / (d_in ** 0.5)
    bound2 = 1.0 / (hidden ** 0.5)
    w1 = jax.random.uniform(k1, (d_in, hidden), dtype, -bound1, bound1)
    b1 = jax.random.uniform(k2, (1, hidden), dtype, -bound1, bound1)
    w2 = jax.random.uniform(k3, (hidden, d_out), dtype, -bound2, bound2)
    b2 = jax.random.uniform(k4, (1, d_out), dtype, -bound2, bound2)
    return (w1, b1, w2, b2)


def decoder_reference(node_features, params, compute_dtype=jnp.bfloat16):
    """Pure-JAX reference mirroring the kernel's bf16-operand / f32-accum math."""
    w1, b1, w2, b2 = params
    f32 = jnp.float32
    x = node_features.astype(compute_dtype).astype(f32)
    w1q = w1.astype(compute_dtype).astype(f32)
    w2q = w2.astype(compute_dtype).astype(f32)
    h = jnp.maximum(x @ w1q + b1.reshape(1, -1).astype(f32), 0.0)
    h = h.astype(compute_dtype).astype(f32)
    return h @ w2q + b2.reshape(1, -1).astype(f32)


if __name__ == "__main__":
    key = jax.random.PRNGKey(0)
    k_x, k_p = jax.random.split(key)

    # Small graph consistent with the module: 1000 nodes (not a multiple of
    # the tile -> exercises the ragged/padded path), latent width 32, decoder
    # output size 8.  Node latents arrive in bf16, as the upstream processor
    # would produce them (halves the dominant HBM read stream).
    num_nodes, latent, d_out = 1000, 32, 8
    node_features = jax.random.normal(
        k_x, (num_nodes, latent), dtype=jnp.float32).astype(jnp.bfloat16)
    params = init_decoder_params(k_p, latent, latent, d_out)

    # One-time, generation-aware weight expansion (kept out of the hot path).
    pack = _default_pack()
    expanded = expand_decoder_params(params, pack=pack,
                                     compute_dtype=jnp.bfloat16)

    fwd = jax.jit(functools.partial(decoder_forward, pack=pack))
    out = jax.block_until_ready(fwd(node_features, expanded))

    ref = decoder_reference(node_features, params)
    assert out.shape == (num_nodes, d_out), out.shape
    assert out.dtype == jnp.float32, out.dtype
    max_err = jnp.max(jnp.abs(out - ref))
    assert jnp.allclose(out, ref, atol=5e-3, rtol=5e-3), f"max abs err {max_err}"

    print("KERNEL_OK")
</pallas_src>

<mosaic_0001>
module attributes {stable_mosaic.version = 11 : i64} {
  func.func @_decoder_mlp_kernel(%arg0: i32, %arg1: memref<125x256xbf16, #tpu.memory_space<vmem>>, %arg2: memref<256x256xbf16, #tpu.memory_space<vmem>>, %arg3: memref<1x256xf32, #tpu.memory_space<vmem>>, %arg4: memref<256x64xbf16, #tpu.memory_space<vmem>>, %arg5: memref<1x64xf32, #tpu.memory_space<vmem>>, %arg6: memref<125x64xf32, #tpu.memory_space<vmem>>) attributes {dimension_semantics = [#tpu.dimension_semantics<parallel>], iteration_bounds = array<i64: 1>, scalar_prefetch = 0 : i64, scratch_operands = 0 : i64, tpu.core_type = #tpu.core_type<tc>, window_params = [{transform_indices = @transform_0, window_bounds = array<i64: 125, 256>}, {pipeline_mode = #tpu.pipeline_mode<synchronous>, transform_indices = @transform_1, window_bounds = array<i64: 256, 256>}, {pipeline_mode = #tpu.pipeline_mode<synchronous>, transform_indices = @transform_2, window_bounds = array<i64: 1, 256>}, {pipeline_mode = #tpu.pipeline_mode<synchronous>, transform_indices = @transform_3, window_bounds = array<i64: 256, 64>}, {pipeline_mode = #tpu.pipeline_mode<synchronous>, transform_indices = @transform_4, window_bounds = array<i64: 1, 64>}, {transform_indices = @transform_5, window_bounds = array<i64: 125, 64>}]} {
    %c0 = arith.constant 0 : index
    %c0_0 = arith.constant 0 : index
    %0 = vector.load %arg2[%c0, %c0_0] : memref<256x256xbf16, #tpu.memory_space<vmem>>, vector<256x256xbf16>
    %c0_1 = arith.constant 0 : index
    %c0_2 = arith.constant 0 : index
    %1 = vector.load %arg4[%c0_1, %c0_2] : memref<256x64xbf16, #tpu.memory_space<vmem>>, vector<256x64xbf16>
    %c0_3 = arith.constant 0 : index
    %c0_4 = arith.constant 0 : index
    %2 = vector.load %arg3[%c0_3, %c0_4] : memref<1x256xf32, #tpu.memory_space<vmem>>, vector<1x256xf32>
    %3 = vector.shape_cast %2 : vector<1x256xf32> to vector<1x256xf32>
    %4 = vector.broadcast %3 : vector<1x256xf32> to vector<64x256xf32>
    %c0_5 = arith.constant 0 : index
    %c0_6 = arith.constant 0 : index
    %5 = vector.load %arg5[%c0_5, %c0_6] : memref<1x64xf32, #tpu.memory_space<vmem>>, vector<1x64xf32>
    %6 = vector.shape_cast %5 : vector<1x64xf32> to vector<1x64xf32>
    %7 = vector.broadcast %6 : vector<1x64xf32> to vector<64x64xf32>
    %c0_i32 = arith.constant 0 : i32
    %c64_i32 = arith.constant 64 : i32
    %8 = arith.muli %c0_i32, %c64_i32 : i32
    %9 = tpu.assume_multiple %8, 64 : i32
    %10 = arith.index_cast %9 : i32 to index
    %c0_7 = arith.constant 0 : index
    %11 = vector.load %arg1[%10, %c0_7] : memref<125x256xbf16, #tpu.memory_space<vmem>>, vector<64x256xbf16>
    %cst = arith.constant dense<0.000000e+00> : vector<64x256xf32>
    %12 = tpu.matmul %11, %0, %cst {dimension_numbers = #tpu.dot_dimension_numbers<[1], [0], [0], [1], [0, 0, 1, 1], [], []>} : vector<64x256xbf16>, vector<256x256xbf16>, vector<64x256xf32> -> vector<64x256xf32>
    %13 = arith.addf %12, %4 : vector<64x256xf32>
    %cst_8 = arith.constant 0.000000e+00 : f32
    %14 = vector.broadcast %cst_8 : f32 to vector<64x256xf32>
    %15 = arith.maximumf %13, %14 : vector<64x256xf32>
    %16 = arith.truncf %15 : vector<64x256xf32> to vector<64x256xbf16>
    %cst_9 = arith.constant dense<0.000000e+00> : vector<64x64xf32>
    %17 = tpu.matmul %16, %1, %cst_9 {dimension_numbers = #tpu.dot_dimension_numbers<[1], [0], [0], [1], [0, 0, 1, 1], [], []>} : vector<64x256xbf16>, vector<256x64xbf16>, vector<64x64xf32> -> vector<64x64xf32>
    %18 = arith.addf %17, %7 : vector<64x64xf32>
    %19 = arith.index_cast %9 : i32 to index
    %c0_10 = arith.constant 0 : index
    %20 = vector.load %arg6[%19, %c0_10] : memref<125x64xf32, #tpu.memory_space<vmem>>, vector<64x64xf32>
    tpu.vector_store %arg6[%19, %c0_10], %18 {strides = array<i32>} : memref<125x64xf32, #tpu.memory_space<vmem>>, vector<64x64xf32>,
    %c1_i32 = arith.constant 1 : i32
    %c0_11 = arith.constant 0 : index
    %c0_12 = arith.constant 0 : index
    %21 = vector.load %arg3[%c0_11, %c0_12] : memref<1x256xf32, #tpu.memory_space<vmem>>, vector<1x256xf32>
    %22 = vector.shape_cast %21 : vector<1x256xf32> to vector<1x256xf32>
    %23 = vector.broadcast %22 : vector<1x256xf32> to vector<61x256xf32>
    %c0_13 = arith.constant 0 : index
    %c0_14 = arith.constant 0 : index
    %24 = vector.load %arg5[%c0_13, %c0_14] : memref<1x64xf32, #tpu.memory_space<vmem>>, vector<1x64xf32>
    %25 = vector.shape_cast %24 : vector<1x64xf32> to vector<1x64xf32>
    %26 = vector.broadcast %25 : vector<1x64xf32> to vector<61x64xf32>
    %c64 = arith.constant 64 : index
    %c0_15 = arith.constant 0 : index
    %27 = vector.load %arg1[%c64, %c0_15] : memref<125x256xbf16, #tpu.memory_space<vmem>>, vector<61x256xbf16>
    %cst_16 = arith.constant dense<0.000000e+00> : vector<61x256xf32>
    %28 = tpu.matmul %27, %0, %cst_16 {dimension_numbers = #tpu.dot_dimension_numbers<[1], [0], [0], [1], [0, 0, 1, 1], [], []>} : vector<61x256xbf16>, vector<256x256xbf16>, vector<61x256xf32> -> vector<61x256xf32>
    %29 = arith.addf %28, %23 : vector<61x256xf32>
    %cst_17 = arith.constant 0.000000e+00 : f32
    %30 = vector.broadcast %cst_17 : f32 to vector<61x256xf32>
    %31 = arith.maximumf %29, %30 : vector<61x256xf32>
    %32 = arith.truncf %31 : vector<61x256xf32> to vector<61x256xbf16>
    %cst_18 = arith.constant dense<0.000000e+00> : vector<61x64xf32>
    %33 = tpu.matmul %32, %1, %cst_18 {dimension_numbers = #tpu.dot_dimension_numbers<[1], [0], [0], [1], [0, 0, 1, 1], [], []>} : vector<61x256xbf16>, vector<256x64xbf16>, vector<61x64xf32> -> vector<61x64xf32>
    %34 = arith.addf %33, %26 : vector<61x64xf32>
    %c64_19 = arith.constant 64 : index
    %c0_20 = arith.constant 0 : index
    %35 = vector.load %arg6[%c64_19, %c0_20] : memref<125x64xf32, #tpu.memory_space<vmem>>, vector<61x64xf32>
    tpu.vector_store %arg6[%c64_19, %c0_20], %34 {strides = array<i32>} : memref<125x64xf32, #tpu.memory_space<vmem>>, vector<61x64xf32>,
    return
  }
  func.func @transform_0(%arg0: i32) -> (i32, i32) {
    %c0_i32 = arith.constant 0 : i32
    %c0_i32_0 = arith.constant 0 : i32
    return %arg0, %c0_i32 : i32, i32
  }
  func.func @transform_1(%arg0: i32) -> (i32, i32) {
    %c0_i32 = arith.constant 0 : i32
    %c0_i32_0 = arith.constant 0 : i32
    %c0_i32_1 = arith.constant 0 : i32
    return %c0_i32, %c0_i32_0 : i32, i32
  }
  func.func @transform_2(%arg0: i32) -> (i32, i32) {
    %c0_i32 = arith.constant 0 : i32
    %c0_i32_0 = arith.constant 0 : i32
    %c0_i32_1 = arith.constant 0 : i32
    return %c0_i32, %c0_i32_0 : i32, i32
  }
  func.func @transform_3(%arg0: i32) -> (i32, i32) {
    %c0_i32 = arith.constant 0 : i32
    %c0_i32_0 = arith.constant 0 : i32
    %c0_i32_1 = arith.constant 0 : i32
    return %c0_i32, %c0_i32_0 : i32, i32
  }
  func.func @transform_4(%arg0: i32) -> (i32, i32) {
    %c0_i32 = arith.constant 0 : i32
    %c0_i32_0 = arith.constant 0 : i32
    %c0_i32_1 = arith.constant 0 : i32
    return %c0_i32, %c0_i32_0 : i32, i32
  }
  func.func @transform_5(%arg0: i32) -> (i32, i32) {
    %c0_i32 = arith.constant 0 : i32
    %c0_i32_0 = arith.constant 0 : i32
    return %arg0, %c0_i32 : i32, i32
  }
}

</mosaic_0001>

<bundles_post_ra>
// kernel: decoder_forward.1
= control target key start
LH: loop header
LB: loop body
LE: loop exit
PB: predicated region body
PF: predicated region fallthrough
CT: control target
= control target key end

     0   :  { %v87_v56 = vlaneseq  ;;  %vm573_vm0 = vcmask 523264   ;;  %vm818_vm1 = vcmask 520192   ;;  %s1530_s1 = inlined_call_operand.vmem [shape: bf16[256,256], index: 1, kind: input, shape index: {}]   ;;  %s1531_s0 = inlined_call_operand.vmem [shape: bf16[125,256], index: 0, kind: input, shape index: {}]   ;;  %s1532_s3 = inlined_call_operand.vmem [shape: bf16[256,64], index: 3, kind: input, shape index: {}]   ;;  %s1533_s2 = inlined_call_operand.vmem [shape: f32[1,256], index: 2, kind: input, shape index: {}]   ;;  %s1534_s4 = inlined_call_operand.vmem [shape: f32[1,64], index: 4, kind: input, shape index: {}]   ;;  %s1535_s5 = inlined_call_operand.vmem [shape: f32[125,64], index: 5, kind: output, shape index: {}]  }
   0x1   :  { %v1091_v0 = vld [vmem:[%s1530_s1 + $0x4] ss:$8 sps:$4 sm:$0xff]   ;;  %v1096_v1 = vld [vmem:[%s1530_s1] ss:$8 sps:$4 sm:$0xff]   ;;  %v1102_v2 = vld [vmem:[%s1530_s1 + $0x14] ss:$8 sps:$4 sm:$0xff]  }
   0x2   :  { %315 = vmatprep.subr.bf16.mxu0 %v1091_v0  ;;  %v1108_v3 = vld [vmem:[%s1530_s1 + $0x10] ss:$8 sps:$4 sm:$0xff]   ;;  %v1114_v4 = vld [vmem:[%s1530_s1 + $0x24] ss:$8 sps:$4 sm:$0xff]   ;;  %v1120_v5 = vld [vmem:[%s1530_s1 + $0x20] ss:$8 sps:$4 sm:$0xff]  }
   0x3   :  { %316 = vmatpush1.bf16.msra.mxu0 %v1096_v1  ;;  %v1126_v6 = vld [vmem:[%s1530_s1 + $0x34] ss:$8 sps:$4 sm:$0xff]   ;;  %v1132_v7 = vld [vmem:[%s1530_s1 + $0x30] ss:$8 sps:$4 sm:$0xff]   ;;  %v1138_v8 = vld [vmem:[%s1530_s1 + $0x44] ss:$8 sps:$4 sm:$0xff]  }
   0x4   :  { %317 = vmatprep.subr.bf16.mxu0 %v1102_v2  ;;  %v1144_v9 = vld [vmem:[%s1530_s1 + $0x40] ss:$8 sps:$4 sm:$0xff]   ;;  %v1150_v10 = vld [vmem:[%s1530_s1 + $0x54] ss:$8 sps:$4 sm:$0xff]   ;;  %v1156_v11 = vld [vmem:[%s1530_s1 + $0x50] ss:$8 sps:$4 sm:$0xff]  }
   0x5   :  { %v1162_v12 = vld [vmem:[%s1530_s1 + $0x64] ss:$8 sps:$4 sm:$0xff]   ;;  %v1171_v14 = vld [vmem:[%s1530_s1 + $0x60] ss:$8 sps:$4 sm:$0xff]   ;;  %v1177_v15 = vld [vmem:[%s1530_s1 + $0x74] ss:$8 sps:$4 sm:$0xff]  }
   0x6   :  { %v1020_v13 = vld [vmem:[%s1531_s0 + $0x4] ss:$8 sps:$4 sm:$0xff]   ;;  %v1182_v16 = vld [vmem:[%s1530_s1 + $0x70] ss:$8 sps:$4 sm:$0xff]   ;;  %v1200_v20 = vld [vmem:[%s1530_s1 + $0x80] ss:$8 sps:$4 sm:$0xff]  }
   0x7   :  { %318 = vmatpush1.bf16.msra.mxu0 %v1108_v3  ;;  %347 = vmatprep.mubr.bf16.mxu0 %v1020_v13  ;;  %v1187_v17 = vld [vmem:[%s1530_s1 + $0x84] ss:$8 sps:$4 sm:$0xff]   ;;  %v1034_v23 = vld [vmem:[%s1532_s3 + $0x50] sm:$0xff]   ;;  %v1036_v27 = vld [vmem:[%s1532_s3 + $0x58] sm:$0xff]   ;;  %v1353_v57 = vshrl.u32 %v87_v56, 7 }
   0x8   :  { %319 = vmatprep.subr.bf16.mxu0 %v1114_v4  ;;  %v1030_v18 = vld [vmem:[%s1532_s3 + $0x40] sm:$0xff]   ;;  %v1032_v21 = vld [vmem:[%s1532_s3 + $0x48] sm:$0xff]   ;;  %v1216_v24 = vld [vmem:[%s1530_s1 + $0x94] ss:$8 sps:$4 sm:$0xff]  }
   0x9   :  { %v1031_v19 = vld [vmem:[%s1532_s3] sm:$0xff]   ;;  %890 = vmatprep.subr.bf16.mxu1 %v1030_v18  ;;  %v1033_v22 = vld [vmem:[%s1532_s3 + $0x8] sm:$0xff]   ;;  %v1221_v25 = vld [vmem:[%s1530_s1 + $0x90] ss:$8 sps:$4 sm:$0xff]   ;;  %v89_v58 = vsub.s32 0, %v1353_v57  ;;  %v93_v60 = vsub.s32 1, %v1353_v57 }
   0xa   :  { %891 = vmatpush3.bf16.msra.mxu1 %v1031_v19  ;;  %v1035_v26 = vld [vmem:[%s1532_s3 + $0x10] sm:$0xff]   ;;  %v1234_v28 = vld [vmem:[%s1530_s1 + $0xa4] ss:$8 sps:$4 sm:$0xff]   ;;  %v1239_v29 = vld [vmem:[%s1530_s1 + $0xa0] ss:$8 sps:$4 sm:$0xff]  }
   0xb   :  { %320 = vmatpush1.bf16.msra.mxu0 %v1120_v5  ;;  %892 = vmatprep.subr.bf16.mxu1 %v1032_v21  ;;  %v1244_v30 = vld [vmem:[%s1530_s1 + $0xb4] ss:$8 sps:$4 sm:$0xff]   ;;  %v1038_v32 = vld [vmem:[%s1532_s3 + $0x60] sm:$0xff]   ;;  %v1260_v34 = vld [vmem:[%s1530_s1 + $0xb0] ss:$8 sps:$4 sm:$0xff]  }
   0xc   :  { %321 = vmatprep.subr.bf16.mxu0 %v1126_v6  ;;  %v1037_v31 = vld [vmem:[%s1532_s3 + $0x18] sm:$0xff]   ;;  %v1039_v33 = vld [vmem:[%s1532_s3 + $0x20] sm:$0xff]   ;;  %v1040_v35 = vld [vmem:[%s1532_s3 + $0x68] sm:$0xff]  }
   0xd   :  { %v1270_v36 = vld [vmem:[%s1530_s1 + $0xc4] ss:$8 sps:$4 sm:$0xff]   ;;  %v1279_v38 = vld [vmem:[%s1530_s1 + $0xc0] ss:$8 sps:$4 sm:$0xff]   ;;  %v1285_v39 = vld [vmem:[%s1530_s1 + $0xd4] ss:$8 sps:$4 sm:$0xff]  }
   0xe   :  { %893 = vmatpush3.bf16.msra.mxu1 %v1033_v22  ;;  %v1041_v37 = vld [vmem:[%s1532_s3 + $0x28] sm:$0xff]   ;;  %v1291_v40 = vld [vmem:[%s1530_s1 + $0xd0] ss:$8 sps:$4 sm:$0xff]   ;;  %v1309_v43 = vld [vmem:[%s1530_s1 + $0xf4] ss:$8 sps:$4 sm:$0xff]  }
   0xf   :  { %322 = vmatpush1.bf16.msra.mxu0 %v1132_v7  ;;  %894 = vmatprep.subr.bf16.mxu1 %v1034_v23  ;;  %v1297_v41 = vld [vmem:[%s1530_s1 + $0xe4] ss:$8 sps:$4 sm:$0xff]   ;;  %v1303_v42 = vld [vmem:[%s1530_s1 + $0xe0] ss:$8 sps:$4 sm:$0xff]   ;;  %v1315_v44 = vld [vmem:[%s1530_s1 + $0xf0] ss:$8 sps:$4 sm:$0xff]  }
  0x10   :  { %323 = vmatprep.subr.bf16.mxu0 %v1138_v8  ;;  %v1018_v45 = vld [vmem:[%s1531_s0] ss:$8 sps:$4 sm:$0xff]   ;;  %v1021_v46 = vld [vmem:[%s1531_s0 + $0x14] ss:$8 sps:$4 sm:$0xff]   ;;  %v1023_v47 = vld [vmem:[%s1531_s0 + $0x10] ss:$8 sps:$4 sm:$0xff]  }
  0x11   :  { %v1024_v48 = vld [vmem:[%s1531_s0 + $0x24] ss:$8 sps:$4 sm:$0xff]   ;;  %v1026_v49 = vld [vmem:[%s1531_s0 + $0x20] ss:$8 sps:$4 sm:$0xff]   ;;  %v1027_v50 = vld [vmem:[%s1531_s0 + $0x34] ss:$8 sps:$4 sm:$0xff]  }
  0x12   :  { %895 = vmatpush3.bf16.msra.mxu1 %v1035_v26  ;;  %v1029_v51 = vld [vmem:[%s1531_s0 + $0x30] ss:$8 sps:$4 sm:$0xff]   ;;  %v85_v59 = vld [vmem:[%s1533_s2] sm:$0x3] }
  0x13   :  { %324 = vmatpush1.bf16.msra.mxu0 %v1144_v9  ;;  %896 = vmatprep.subr.bf16.mxu1 %v1036_v27  ;;  %v1042_v52 = vld [vmem:[%s1532_s3 + $0x70] sm:$0xff]   ;;  %v1044_v54 = vld [vmem:[%s1532_s3 + $0x78] sm:$0xff]   ;;  %v1362_v61 = vrot.slane %v85_v59, %v89_v58  ;;  %v1366_v62 = vrot.slane %v85_v59, %v93_v60 }
  0x14   :  { %325 = vmatprep.subr.bf16.mxu0 %v1150_v10  ;;  %v1043_v53 = vld [vmem:[%s1532_s3 + $0x30] sm:$0xff]   ;;  %v1045_v55 = vld [vmem:[%s1532_s3 + $0x38] sm:$0xff]  }
  0x16   :  { %897 = vmatpush3.bf16.msra.mxu1 %v1037_v31 }
  0x17   :  { %326 = vmatpush1.bf16.msra.mxu0 %v1156_v11  ;;  %898 = vmatprep.subr.bf16.mxu1 %v1038_v32 }
  0x18   :  { %327 = vmatprep.subr.bf16.mxu0 %v1162_v12 }
  0x1a   :  { %899 = vmatpush3.bf16.msra.mxu1 %v1039_v33 }
  0x1b   :  { %328 = vmatpush1.bf16.msra.mxu0 %v1171_v14  ;;  %900 = vmatprep.subr.bf16.mxu1 %v1040_v35 }
  0x1c   :  { %329 = vmatprep.subr.bf16.mxu0 %v1177_v15 }
  0x1e   :  { %901 = vmatpush3.bf16.msra.mxu1 %v1041_v37 }
  0x1f   :  { %330 = vmatpush1.bf16.msra.mxu0 %v1182_v16  ;;  %902 = vmatprep.subr.bf16.mxu1 %v1042_v52 }
  0x20   :  { %331 = vmatprep.subr.bf16.mxu0 %v1187_v17 }
  0x22   :  { %903 = vmatpush3.bf16.msra.mxu1 %v1043_v53 }
  0x23   :  { %332 = vmatpush1.bf16.msra.mxu0 %v1200_v20  ;;  %904 = vmatprep.subr.bf16.mxu1 %v1044_v54 }
  0x24   :  { %333 = vmatprep.subr.bf16.mxu0 %v1216_v24 }
  0x26   :  { %905 = vmatpush3.bf16.msra.mxu1 %v1045_v55 }
  0x27   :  { %334 = vmatpush1.bf16.msra.mxu0 %v1221_v25  ;;  %649 = vmatprep.subr.bf16.mxu1 %v1091_v0 }
  0x28   :  { %335 = vmatprep.subr.bf16.mxu0 %v1234_v28 }
  0x2b   :  { %336 = vmatpush1.bf16.msra.mxu0 %v1239_v29 }
  0x2c   :  { %337 = vmatprep.subr.bf16.mxu0 %v1244_v30 }
  0x2f   :  { %338 = vmatpush1.bf16.msra.mxu0 %v1260_v34 }
  0x30   :  { %339 = vmatprep.subr.bf16.mxu0 %v1270_v36 }
  0x33   :  { %340 = vmatpush1.bf16.msra.mxu0 %v1279_v38 }
  0x34   :  { %341 = vmatprep.subr.bf16.mxu0 %v1285_v39 }
  0x37   :  { %342 = vmatpush1.bf16.msra.mxu0 %v1291_v40 }
  0x38   :  { %343 = vmatprep.subr.bf16.mxu0 %v1297_v41 }
  0x3b   :  { %344 = vmatpush1.bf16.msra.mxu0 %v1303_v42 }
  0x3c   :  { %345 = vmatprep.subr.bf16.mxu0 %v1309_v43 }
  0x3f   :  { %346 = vmatpush1.bf16.msra.mxu0 %v1315_v44 }
  0x40   :  { %930 = vmatprep.subr.bf16.mxu0 %v1030_v18 }
  0x42   :  { %348 = vmatmul.mubr.bf16.vlgmr.msra.gmra.mrb[0].mxu0 %v1018_v45 }
  0x43   :  { %357 = vmatprep.mubr.bf16.mxu0 %v1021_v46  ;;  %931 = vmatpush3.bf16.msra.mxu0 %v1031_v19 }
  0x44   :  { %932 = vmatprep.subr.bf16.mxu0 %v1032_v21 }
  0x47   :  { %933 = vmatpush3.bf16.msra.mxu0 %v1033_v22 }
  0x48   :  { %934 = vmatprep.subr.bf16.mxu0 %v1034_v23 }
  0x4a   :  { %358 = vmatmul.mubr.bf16.gmra.mrb[4].mxu0 %v1023_v47 }
  0x4b   :  { %367 = vmatprep.mubr.bf16.mxu0 %v1024_v48  ;;  %935 = vmatpush3.bf16.msra.mxu0 %v1035_v26 }
  0x4c   :  { %936 = vmatprep.subr.bf16.mxu0 %v1036_v27 }
  0x4f   :  { %937 = vmatpush3.bf16.msra.mxu0 %v1037_v31 }
  0x50   :  { %938 = vmatprep.subr.bf16.mxu0 %v1038_v32 }
  0x52   :  { %368 = vmatmul.mubr.bf16.gmra.mrb[8].mxu0 %v1026_v49 }
  0x53   :  { %377 = vmatprep.mubr.bf16.mxu0 %v1027_v50  ;;  %939 = vmatpush3.bf16.msra.mxu0 %v1039_v33 }
  0x54   :  { %940 = vmatprep.subr.bf16.mxu0 %v1040_v35 }
  0x57   :  { %941 = vmatpush3.bf16.msra.mxu0 %v1041_v37 }
  0x58   :  { %942 = vmatprep.subr.bf16.mxu0 %v1042_v52 }
  0x5a   :  { %378 = vmatmul.mubr.bf16.gmra.mrb[12].mxu0 %v1029_v51 }
  0x5b   :  { %943 = vmatpush3.bf16.msra.mxu0 %v1043_v53 }
  0x5c   :  { %944 = vmatprep.subr.bf16.mxu0 %v1044_v54 }
  0x5f   :  { %945 = vmatpush3.bf16.msra.mxu0 %v1045_v55 }
 0x115   :  { %v349_v63 = vpop.f32.mrb[0].mxu0 }
 0x116   :  { %v350_v0 = vadd.f32 %v349_v63, %v1362_v61  ;;  %v351_v13 = vpop.f32.mrb[1].mxu0 }
 0x117   :  { %v352_v18 = vadd.f32 %v351_v13, %v1366_v62  ;;  %v353_v19 = vpop.f32.mrb[2].mxu0 }
 0x118   :  { %v354_v21 = vadd.f32 %v353_v19, %v1362_v61  ;;  %v355_v22 = vpop.f32.mrb[3].mxu0  ;;  %v388_v26 = vmax.f32 %v350_v0, 0.0 }
 0x119   :  { %v356_v23 = vadd.f32 %v355_v22, %v1366_v62  ;;  %v389_v31 = vmax.f32 %v352_v18, 0.0 }
 0x11a   :  { %v390_v27 = vmax.f32 %v354_v21, 0.0 }
 0x11b   :  { %v391_v32 = vmax.f32 %v356_v23, 0.0 }
 0x11c   :  { %v404_v33 = vpack.c.bf16 %v390_v27, %v388_v26 }
 0x11d   :  { %v405_v35 = vpack.c.bf16 %v391_v32, %v389_v31  ;;  %v359_v37 = vpop.f32.mrb[4].mxu0 }
 0x11e   :  { %v360_v45 = vadd.f32 %v359_v37, %v1362_v61  ;;  %v361_v46 = vpop.f32.mrb[5].mxu0 }
 0x11f   :  { %540 = vmatprep.mubr.bf16.mxu1 %v405_v35  ;;  %v362_v47 = vadd.f32 %v361_v46, %v1366_v62  ;;  %v363_v48 = vpop.f32.mrb[6].mxu0 }
 0x120   :  { %541 = vmatmul.mubr.bf16.vlgmr.msra.gmra.mrb[0].mxu1 %v404_v33  ;;  %v392_v49 = vmax.f32 %v360_v45, 0.0  ;;  %v364_v50 = vadd.f32 %v363_v48, %v1362_v61  ;;  %v365_v51 = vpop.f32.mrb[7].mxu0 }
 0x121   :  { %650 = vmatpush1.bf16.msra.mxu1 %v1096_v1  ;;  %v393_v52 = vmax.f32 %v362_v47, 0.0  ;;  %v366_v53 = vadd.f32 %v365_v51, %v1366_v62 }
 0x122   :  { %651 = vmatprep.subr.bf16.mxu1 %v1102_v2  ;;  %v394_v54 = vmax.f32 %v364_v50, 0.0  ;;  %v1048_v50 = vld [vmem:[%s1531_s0 + $0x44] ss:$8 sps:$4 sm:$0xff]  }
 0x123   :  { %v395_v55 = vmax.f32 %v366_v53, 0.0 }
 0x124   :  { %v406_v56 = vpack.c.bf16 %v394_v54, %v392_v49 }
 0x125   :  { %652 = vmatpush1.bf16.msra.mxu1 %v1108_v3  ;;  %v407_v59 = vpack.c.bf16 %v395_v55, %v393_v52  ;;  %v369_v63 = vpop.f32.mrb[8].mxu0 }
 0x126   :  { %653 = vmatprep.subr.bf16.mxu1 %v1114_v4  ;;  %v370_v0 = vadd.f32 %v369_v63, %v1362_v61  ;;  %v371_v13 = vpop.f32.mrb[9].mxu0 }
 0x127   :  { %v372_v18 = vadd.f32 %v371_v13, %v1366_v62  ;;  %v373_v1 = vpop.f32.mrb[10].mxu0  ;;  %548 = vmatprep.mubr.bf16.mxu1 %v407_v59 }
 0x128   :  { %v396_v19 = vmax.f32 %v370_v0, 0.0  ;;  %v374_v21 = vadd.f32 %v373_v1, %v1362_v61  ;;  %v375_v2 = vpop.f32.mrb[11].mxu0  ;;  %549 = vmatmul.mubr.bf16.gmra.mrb[4].mxu1 %v406_v56 }
 0x129   :  { %654 = vmatpush1.bf16.msra.mxu1 %v1120_v5  ;;  %v397_v22 = vmax.f32 %v372_v18, 0.0  ;;  %v376_v3 = vadd.f32 %v375_v2, %v1366_v62 }
 0x12a   :  { %655 = vmatprep.subr.bf16.mxu1 %v1126_v6  ;;  %v398_v4 = vmax.f32 %v374_v21, 0.0 }
 0x12b   :  { %v399_v23 = vmax.f32 %v376_v3, 0.0 }
 0x12c   :  { %v408_v26 = vpack.c.bf16 %v398_v4, %v396_v19 }
 0x12d   :  { %656 = vmatpush1.bf16.msra.mxu1 %v1132_v7  ;;  %v409_v27 = vpack.c.bf16 %v399_v23, %v397_v22  ;;  %v379_v31 = vpop.f32.mrb[12].mxu0  ;;  %v582_v22 = vld [vmem:[%s1533_s2] sm:$0x3] }
 0x12e   :  { %657 = vmatprep.subr.bf16.mxu1 %v1138_v8  ;;  %v380_v32 = vadd.f32 %v379_v31, %v1362_v61  ;;  %v381_v33 = vpop.f32.mrb[13].mxu0  ;;  %v587_v3 = vrot.slane %v582_v22, %v89_v58  ;;  %v591_v4 = vrot.slane %v582_v22, %v93_v60 }
 0x12f   :  { %v382_v35 = vadd.f32 %v381_v33, %v1366_v62  ;;  %v383_v5 = vpop.f32.mrb[14].mxu0  ;;  %556 = vmatprep.mubr.bf16.mxu1 %v409_v27 }
 0x130   :  { %v400_v37 = vmax.f32 %v380_v32, 0.0  ;;  %v384_v45 = vadd.f32 %v383_v5, %v1362_v61  ;;  %v385_v6 = vpop.f32.mrb[15].mxu0  ;;  %557 = vmatmul.mubr.bf16.gmra.mrb[8].mxu1 %v408_v26 }
 0x131   :  { %658 = vmatpush1.bf16.msra.mxu1 %v1144_v9  ;;  %v401_v46 = vmax.f32 %v382_v35, 0.0  ;;  %v386_v7 = vadd.f32 %v385_v6, %v1366_v62  ;;  %v1046_v9 = vld [vmem:[%s1531_s0 + $0x40] ss:$8 sps:$4 sm:$0xff]  }
 0x132   :  { %659 = vmatprep.subr.bf16.mxu1 %v1150_v10  ;;  %v402_v8 = vmax.f32 %v384_v45, 0.0  ;;  %v1049_v10 = vld [vmem:[%s1531_s0 + $0x54] ss:$8 sps:$4 sm:$0xff]  }
 0x133   :  { %v403_v47 = vmax.f32 %v386_v7, 0.0 }
 0x134   :  { %v410_v48 = vpack.c.bf16 %v402_v8, %v400_v37 }
 0x135   :  { %660 = vmatpush1.bf16.msra.mxu1 %v1156_v11  ;;  %v411_v49 = vpack.c.bf16 %v403_v47, %v401_v46  ;;  %v1051_v11 = vld [vmem:[%s1531_s0 + $0x50] ss:$8 sps:$4 sm:$0xff]  }
 0x136   :  { %661 = vmatprep.subr.bf16.mxu1 %v1162_v12  ;;  %v1052_v12 = vld [vmem:[%s1531_s0 + $0x64] ss:$8 sps:$4 sm:$0xff]  }
 0x137   :  { %564 = vmatprep.mubr.bf16.mxu1 %v411_v49 }
 0x138   :  { %565 = vmatmul.mubr.bf16.gmra.mrb[12].mxu1 %v410_v48 }
 0x139   :  { %662 = vmatpush1.bf16.msra.mxu1 %v1171_v14  ;;  %681 = vmatprep.mubr.bf16.mxu1 %v1048_v50  ;;  %v1054_v14 = vld [vmem:[%s1531_s0 + $0x60] ss:$8 sps:$4 sm:$0xff]  }
 0x13a   :  { %663 = vmatprep.subr.bf16.mxu1 %v1177_v15  ;;  %v1055_v15 = vld [vmem:[%s1531_s0 + $0x74] ss:$8 sps:$4 sm:$0x7f]  }
 0x13d   :  { %664 = vmatpush1.bf16.msra.mxu1 %v1182_v16  ;;  %v1057_v16 = vld [vmem:[%s1531_s0 + $0x70] ss:$8 sps:$4 sm:$0x7f]  }
 0x13e   :  { %665 = vmatprep.subr.bf16.mxu1 %v1187_v17 }
 0x141   :  { %666 = vmatpush1.bf16.msra.mxu1 %v1200_v20  ;;  %v1442_v20 = vld [vmem:[%s1534_s4] ss:$0 sm:$0xff] }
 0x142   :  { %667 = vmatprep.subr.bf16.mxu1 %v1216_v24 }
 0x145   :  { %668 = vmatpush1.bf16.msra.mxu1 %v1221_v25 }
 0x146   :  { %669 = vmatprep.subr.bf16.mxu1 %v1234_v28 }
 0x149   :  { %670 = vmatpush1.bf16.msra.mxu1 %v1239_v29 }
 0x14a   :  { %671 = vmatprep.subr.bf16.mxu1 %v1244_v30 }
 0x14d   :  { %672 = vmatpush1.bf16.msra.mxu1 %v1260_v34 }
 0x14e   :  { %673 = vmatprep.subr.bf16.mxu1 %v1270_v36 }
 0x151   :  { %674 = vmatpush1.bf16.msra.mxu1 %v1279_v38 }
 0x152   :  { %675 = vmatprep.subr.bf16.mxu1 %v1285_v39 }
 0x155   :  { %676 = vmatpush1.bf16.msra.mxu1 %v1291_v40 }
 0x156   :  { %677 = vmatprep.subr.bf16.mxu1 %v1297_v41 }
 0x159   :  { %678 = vmatpush1.bf16.msra.mxu1 %v1303_v42 }
 0x15a   :  { %679 = vmatprep.subr.bf16.mxu1 %v1309_v43 }
 0x15d   :  { %680 = vmatpush1.bf16.msra.mxu1 %v1315_v44 }
 0x160   :  { %682 = vmatmul.mubr.bf16.vlgmr.msra.gmra.mrb[16].mxu1 %v1046_v9 }
 0x161   :  { %691 = vmatprep.mubr.bf16.mxu1 %v1049_v10 }
 0x168   :  { %692 = vmatmul.mubr.bf16.gmra.mrb[20].mxu1 %v1051_v11 }
 0x169   :  { %701 = vmatprep.mubr.bf16.mxu1 %v1052_v12 }
 0x170   :  { %702 = vmatmul.mubr.bf16.gmra.mrb[24].mxu1 %v1054_v14 }
 0x171   :  { %711 = vmatprep.mubr.bf16.mxu1 %v1055_v15 }
 0x178   :  { %712 = vmatmul.mubr.bf16.gmra.mrb[28].mxu1 %v1057_v16 }
 0x1f3   :  { %v906_v17 = vpop.f32.mrb[0].mxu1 }
 0x1f4   :  { %v907_v24 = vpop.f32.mrb[1].mxu1 }
 0x1f5   :  { %v908_v25 = vadd.f32 %v907_v24, %v906_v17  ;;  %v909_v28 = vpop.f32.mrb[2].mxu1 }
 0x1f6   :  { %v910_v29 = vpop.f32.mrb[3].mxu1 }
 0x1f7   :  { %v543_v30 = vadd.f32 %v908_v25, %v1442_v20  ;;  %v911_v34 = vadd.f32 %v910_v29, %v909_v28 }
 0x1f9   :  { %574 = vst.msk [vmem:[%s1535_s5] sm:$0xff] %vm573_vm0, %v543_v30  ;;  %v546_v36 = vadd.f32 %v911_v34, %v1442_v20 }
 0x1fb   :  { %575 = vst.msk [vmem:[%s1535_s5 + $0x8] sm:$0xff] %vm573_vm0, %v546_v36  ;;  %v912_v38 = vpop.f32.mrb[4].mxu1 }
 0x1fc   :  { %v913_v39 = vpop.f32.mrb[5].mxu1 }
 0x1fd   :  { %v914_v40 = vadd.f32 %v913_v39, %v912_v38  ;;  %v915_v41 = vpop.f32.mrb[6].mxu1 }
 0x1fe   :  { %v916_v42 = vpop.f32.mrb[7].mxu1 }
 0x1ff   :  { %v551_v43 = vadd.f32 %v914_v40, %v1442_v20  ;;  %v917_v44 = vadd.f32 %v916_v42, %v915_v41 }
 0x201   :  { %576 = vst.msk [vmem:[%s1535_s5 + $0x10] sm:$0xff] %vm573_vm0, %v551_v43  ;;  %v554_v61 = vadd.f32 %v917_v44, %v1442_v20 }
 0x203   :  { %577 = vst.msk [vmem:[%s1535_s5 + $0x18] sm:$0xff] %vm573_vm0, %v554_v61  ;;  %v918_v62 = vpop.f32.mrb[8].mxu1 }
 0x204   :  { %v919_v51 = vpop.f32.mrb[9].mxu1 }
 0x205   :  { %v920_v52 = vadd.f32 %v919_v51, %v918_v62  ;;  %v921_v53 = vpop.f32.mrb[10].mxu1 }
 0x206   :  { %v922_v54 = vpop.f32.mrb[11].mxu1 }
 0x207   :  { %v559_v55 = vadd.f32 %v920_v52, %v1442_v20  ;;  %v923_v56 = vadd.f32 %v922_v54, %v921_v53 }
 0x209   :  { %578 = vst.msk [vmem:[%s1535_s5 + $0x20] sm:$0xff] %vm573_vm0, %v559_v55  ;;  %v562_v59 = vadd.f32 %v923_v56, %v1442_v20 }
 0x20b   :  { %579 = vst.msk [vmem:[%s1535_s5 + $0x28] sm:$0xff] %vm573_vm0, %v562_v59  ;;  %v924_v63 = vpop.f32.mrb[12].mxu1 }
 0x20c   :  { %v925_v0 = vpop.f32.mrb[13].mxu1 }
 0x20d   :  { %v926_v13 = vadd.f32 %v925_v0, %v924_v63  ;;  %v927_v18 = vpop.f32.mrb[14].mxu1 }
 0x20e   :  { %v928_v1 = vpop.f32.mrb[15].mxu1 }
 0x20f   :  { %v567_v19 = vadd.f32 %v926_v13, %v1442_v20  ;;  %v929_v21 = vadd.f32 %v928_v1, %v927_v18 }
 0x211   :  { %580 = vst.msk [vmem:[%s1535_s5 + $0x30] sm:$0xff] %vm573_vm0, %v567_v19  ;;  %v570_v2 = vadd.f32 %v929_v21, %v1442_v20 }
 0x213   :  { %581 = vst.msk [vmem:[%s1535_s5 + $0x38] sm:$0xff] %vm573_vm0, %v570_v2 }
 0x233   :  { %v683_v23 = vpop.f32.mrb[16].mxu1 }
 0x234   :  { %v684_v26 = vadd.f32 %v683_v23, %v587_v3  ;;  %v685_v27 = vpop.f32.mrb[17].mxu1 }
 0x235   :  { %v686_v31 = vadd.f32 %v685_v27, %v591_v4  ;;  %v687_v32 = vpop.f32.mrb[18].mxu1 }
 0x236   :  { %v688_v33 = vadd.f32 %v687_v32, %v587_v3  ;;  %v689_v35 = vpop.f32.mrb[19].mxu1  ;;  %v722_v37 = vmax.f32 %v684_v26, 0.0 }
 0x237   :  { %v690_v5 = vadd.f32 %v689_v35, %v591_v4  ;;  %v723_v6 = vmax.f32 %v686_v31, 0.0 }
 0x238   :  { %v724_v45 = vmax.f32 %v688_v33, 0.0 }
 0x239   :  { %v725_v46 = vmax.f32 %v690_v5, 0.0 }
 0x23a   :  { %v738_v7 = vpack.c.bf16 %v724_v45, %v722_v37 }
 0x23b   :  { %v739_v8 = vpack.c.bf16 %v725_v46, %v723_v6  ;;  %v693_v47 = vpop.f32.mrb[20].mxu1 }
 0x23c   :  { %v694_v48 = vadd.f32 %v693_v47, %v587_v3  ;;  %v695_v58 = vpop.f32.mrb[21].mxu1 }
 0x23d   :  { %v696_v49 = vadd.f32 %v695_v58, %v591_v4  ;;  %v697_v57 = vpop.f32.mrb[22].mxu1  ;;  %778 = vmatprep.mubr.bf16.mxu0 %v739_v8 }
 0x23e   :  { %v698_v60 = vadd.f32 %v697_v57, %v587_v3  ;;  %v699_v50 = vpop.f32.mrb[23].mxu1  ;;  %779 = vmatmul.mubr.bf16.vlgmr.msra.gmra.mrb[16].mxu0 %v738_v7  ;;  %v726_v10 = vmax.f32 %v694_v48, 0.0 }
 0x23f   :  { %v700_v9 = vadd.f32 %v699_v50, %v591_v4  ;;  %v727_v12 = vmax.f32 %v696_v49, 0.0 }
 0x240   :  { %v728_v11 = vmax.f32 %v698_v60, 0.0 }
 0x241   :  { %v729_v14 = vmax.f32 %v700_v9, 0.0 }
 0x242   :  { %v740_v15 = vpack.c.bf16 %v728_v11, %v726_v10 }
 0x243   :  { %v741_v16 = vpack.c.bf16 %v729_v14, %v727_v12  ;;  %v703_v17 = vpop.f32.mrb[24].mxu1 }
 0x244   :  { %v704_v24 = vadd.f32 %v703_v17, %v587_v3  ;;  %v705_v25 = vpop.f32.mrb[25].mxu1 }
 0x245   :  { %v706_v28 = vadd.f32 %v705_v25, %v591_v4  ;;  %v707_v29 = vpop.f32.mrb[26].mxu1  ;;  %786 = vmatprep.mubr.bf16.mxu0 %v741_v16 }
 0x246   :  { %v708_v30 = vadd.f32 %v707_v29, %v587_v3  ;;  %v709_v34 = vpop.f32.mrb[27].mxu1  ;;  %787 = vmatmul.mubr.bf16.gmra.mrb[20].mxu0 %v740_v15  ;;  %v730_v38 = vmax.f32 %v704_v24, 0.0 }
 0x247   :  { %v710_v36 = vadd.f32 %v709_v34, %v591_v4  ;;  %v731_v40 = vmax.f32 %v706_v28, 0.0 }
 0x248   :  { %v732_v39 = vmax.f32 %v708_v30, 0.0 }
 0x249   :  { %v733_v41 = vmax.f32 %v710_v36, 0.0 }
 0x24a   :  { %v742_v42 = vpack.c.bf16 %v732_v39, %v730_v38 }
 0x24b   :  { %v743_v43 = vpack.c.bf16 %v733_v41, %v731_v40  ;;  %v713_v44 = vpop.f32.mrb[28].mxu1 }
 0x24c   :  { %v714_v61 = vadd.f32 %v713_v44, %v587_v3  ;;  %v715_v62 = vpop.f32.mrb[29].mxu1 }
 0x24d   :  { %v716_v51 = vadd.f32 %v715_v62, %v591_v4  ;;  %v717_v52 = vpop.f32.mrb[30].mxu1  ;;  %794 = vmatprep.mubr.bf16.mxu0 %v743_v43 }
 0x24e   :  { %v718_v53 = vadd.f32 %v717_v52, %v587_v3  ;;  %v719_v54 = vpop.f32.mrb[31].mxu1  ;;  %795 = vmatmul.mubr.bf16.gmra.mrb[24].mxu0 %v742_v42  ;;  %v734_v56 = vmax.f32 %v714_v61, 0.0 }
 0x24f   :  { %v720_v55 = vadd.f32 %v719_v54, %v591_v4  ;;  %v735_v63 = vmax.f32 %v716_v51, 0.0 }
 0x250   :  { %v736_v59 = vmax.f32 %v718_v53, 0.0 }
 0x251   :  { %v737_v0 = vmax.f32 %v720_v55, 0.0 }
 0x252   :  { %v744_v13 = vpack.c.bf16 %v736_v59, %v734_v56 }
 0x253   :  { %v745_v18 = vpack.c.bf16 %v737_v0, %v735_v63 }
 0x255   :  { %802 = vmatprep.mubr.bf16.mxu0 %v745_v18 }
 0x256   :  { %803 = vmatmul.mubr.bf16.gmra.mrb[28].mxu0 %v744_v13 }
 0x311   :  { %v946_v1 = vpop.f32.mrb[16].mxu0 }
 0x312   :  { %v947_v19 = vpop.f32.mrb[17].mxu0 }
 0x313   :  { %v948_v21 = vadd.f32 %v947_v19, %v946_v1  ;;  %v949_v2 = vpop.f32.mrb[18].mxu0 }
 0x314   :  { %v950_v22 = vpop.f32.mrb[19].mxu0 }
 0x315   :  { %v781_v23 = vadd.f32 %v948_v21, %v1442_v20  ;;  %v951_v26 = vadd.f32 %v950_v22, %v949_v2 }
 0x317   :  { %811 = vst.msk [vmem:[%s1535_s5 + $0x40] sm:$0xff] %vm573_vm0, %v781_v23  ;;  %v784_v3 = vadd.f32 %v951_v26, %v1442_v20 }
 0x319   :  { %812 = vst.msk [vmem:[%s1535_s5 + $0x48] sm:$0xff] %vm573_vm0, %v784_v3  ;;  %v952_v4 = vpop.f32.mrb[20].mxu0 }
 0x31a   :  { %v953_v27 = vpop.f32.mrb[21].mxu0 }
 0x31b   :  { %v954_v31 = vadd.f32 %v953_v27, %v952_v4  ;;  %v955_v32 = vpop.f32.mrb[22].mxu0 }
 0x31c   :  { %v956_v33 = vpop.f32.mrb[23].mxu0 }
 0x31d   :  { %v789_v35 = vadd.f32 %v954_v31, %v1442_v20  ;;  %v957_v5 = vadd.f32 %v956_v33, %v955_v32 }
 0x31f   :  { %813 = vst.msk [vmem:[%s1535_s5 + $0x50] sm:$0xff] %vm573_vm0, %v789_v35  ;;  %v792_v37 = vadd.f32 %v957_v5, %v1442_v20 }
 0x321   :  { %814 = vst.msk [vmem:[%s1535_s5 + $0x58] sm:$0xff] %vm573_vm0, %v792_v37  ;;  %v958_v45 = vpop.f32.mrb[24].mxu0 }
 0x322   :  { %v959_v6 = vpop.f32.mrb[25].mxu0 }
 0x323   :  { %v960_v46 = vadd.f32 %v959_v6, %v958_v45  ;;  %v961_v7 = vpop.f32.mrb[26].mxu0 }
 0x324   :  { %v962_v8 = vpop.f32.mrb[27].mxu0 }
 0x325   :  { %v797_v47 = vadd.f32 %v960_v46, %v1442_v20  ;;  %v963_v48 = vadd.f32 %v962_v8, %v961_v7 }
 0x327   :  { %815 = vst.msk [vmem:[%s1535_s5 + $0x60] sm:$0xff] %vm573_vm0, %v797_v47  ;;  %v800_v58 = vadd.f32 %v963_v48, %v1442_v20 }
 0x329   :  { %816 = vst.msk [vmem:[%s1535_s5 + $0x68] sm:$0xff] %vm573_vm0, %v800_v58  ;;  %v964_v49 = vpop.f32.mrb[28].mxu0 }
 0x32a   :  { %v965_v57 = vpop.f32.mrb[29].mxu0 }
 0x32b   :  { %v966_v60 = vadd.f32 %v965_v57, %v964_v49  ;;  %v967_v50 = vpop.f32.mrb[30].mxu0 }
 0x32c   :  { %v968_v9 = vpop.f32.mrb[31].mxu0 }
 0x32d   :  { %v805_v10 = vadd.f32 %v966_v60, %v1442_v20  ;;  %v969_v11 = vadd.f32 %v968_v9, %v967_v50 }
 0x32f   :  { %817 = vst.msk [vmem:[%s1535_s5 + $0x70] sm:$0xff] %vm573_vm0, %v805_v10  ;;  %v808_v12 = vadd.f32 %v969_v11, %v1442_v20 }
 0x331   :  { %819 = vst.msk [vmem:[%s1535_s5 + $0x78] sm:$0x1f] %vm818_vm1, %v808_v12 }

</bundles_post_ra>
